<compile_context>
chip_gen: v7x
topology: tpu7x:2x2x1
jax: 0.10.0
libtpu: 0.0.40
codegen_flags: <defaults>
</compile_context>

<pallas_src>
import functools

import jax
import jax.numpy as jnp
from jax.experimental import pallas as pl
from jax.experimental.pallas import tpu as pltpu


def _dsm_kernel(enc_ref, w_ref, out_ref, *, ts, ns):
    # enc_ref: (ts, tb, D) tile of encoder_out in its native (src, batch, dim) layout.
    # w_ref:   (1, 1, D)   scores2 weight row.
    # out_ref: (tb, S)     lane-dense scores block; same block index across the
    #                      src grid axis -> stays VMEM-resident (accumulator).
    si = pl.program_id(1)

    # Linear(D -> 1, no bias) on the VPU: fused upcast (no standalone f32 slab
    # of enc), broadcast-multiply + lane reduce; then the tiny (ts, tb) block
    # is swapped to (tb, ts) on the XLU so the store is lane-dense on src.
    prod = enc_ref[...] * w_ref[...].astype(jnp.float32)      # promotes to f32
    e_t = jnp.sum(prod, axis=-1).T                            # (tb, ts)

    if ns == 1:
        out_ref[...] = e_t
    else:
        start = pl.multiple_of(si * ts, ts)
        out_ref[:, pl.ds(start, ts)] = e_t

    # Finalize once every src tile of this batch block has been written:
    # softmax over src (lane axis), then relu(x - 0.1).
    @pl.when(si == ns - 1)
    def _():
        scores = out_ref[...]                                 # (tb, S), in VMEM
        m = jnp.max(scores, axis=-1, keepdims=True)           # (tb, 1)
        p = jnp.exp(scores - m)                               # EUP
        denom = jnp.sum(p, axis=-1, keepdims=True)            # (tb, 1)
        # Exact divide: denom is tiny and approx reciprocal can flip values
        # across the relu(x - 0.1) threshold.
        out_ref[...] = jnp.maximum(p / denom - 0.1, 0.0)


def _pick_src_tile(S, tb, D, itemsize, budget_bytes=4 << 20):
    """Largest src-tile (divisor of S, <= 512) keeping the enc block within budget."""
    sub = max(tb, 8)                       # sublane-padded batch extent
    lane = ((D + 127) // 128) * 128        # lane-padded embed extent
    cap = max(1, budget_bytes // (sub * lane * itemsize))
    cap = min(cap, 512, S)
    # Prefer 128-aligned src tiles (lane-aligned dynamic stores) when possible.
    if S % 128 == 0 and cap >= 128:
        ts = (cap // 128) * 128
        while ts >= 128:
            if S % ts == 0:
                return ts
            ts -= 128
    for ts in range(cap, 0, -1):
        if S % ts == 0:
            return ts
    return S


def dynamic_select_mask(encoder_out, decoder_input, decoder_mask, w_scores2):
    """encoder_out: (S, B, D), decoder_input: (T, B, D), decoder_mask: (T, T) bool,
    w_scores2: (1, D) PyTorch-layout Linear weight. Returns (B, T, S) float32.

    decoder_input / decoder_mask only determine the output tgt_len: the pooled
    decoder term cancels inside the softmax over src_len (exact rewrite)."""
    S, B, D = encoder_out.shape
    T = decoder_input.shape[0]
    itemsize = encoder_out.dtype.itemsize

    # Batch tile: multiple of 8 (sublane) or the full batch.
    tb = 8 if (B % 8 == 0) else B
    ts = _pick_src_tile(S, tb, D, itemsize)
    nb, ns = B // tb, S // ts

    w = w_scores2.reshape(1, 1, D)         # keep native dtype; cast fused in-kernel

    # Per-step live VMEM (padded), x2 double-buffering, generous headroom; never
    # above 32 MiB so it is safe on v7x (64 MiB physical / 32 MiB scoped default).
    enc_blk = ts * max(tb, 8) * (((D + 127) // 128) * 128) * itemsize
    out_blk = max(tb, 8) * (((S + 127) // 128) * 128) * 4
    vmem_limit = int(min(32 << 20, max(8 << 20, 6 * (enc_blk + out_blk))))

    cost = pl.CostEstimate(
        flops=2 * S * B * D,
        transcendentals=S * B,
        bytes_accessed=S * B * D * itemsize + B * S * 4 + D * itemsize,
    )

    scores_bs = pl.pallas_call(
        functools.partial(_dsm_kernel, ts=ts, ns=ns),
        out_shape=jax.ShapeDtypeStruct((B, S), jnp.float32),
        grid_spec=pltpu.PrefetchScalarGridSpec(
            num_scalar_prefetch=0,
            grid=(nb, ns),
            in_specs=[
                pl.BlockSpec((ts, tb, D), lambda bi, si: (si, bi, 0)),
                pl.BlockSpec((1, 1, D), lambda bi, si: (0, 0, 0)),
            ],
            out_specs=pl.BlockSpec((tb, S), lambda bi, si: (bi, 0)),
        ),
        compiler_params=pltpu.CompilerParams(
            dimension_semantics=("parallel", "arbitrary"),
            vmem_limit_bytes=vmem_limit,
        ),
        cost_estimate=cost,
    )(encoder_out, w)

    # Module contract is (B, T, S); every tgt row is identical, so this is a
    # broadcast (consumers that can fuse it should take scores_bs directly).
    return jnp.broadcast_to(scores_bs[:, None, :], (B, T, S))


def _reference(encoder_out, decoder_input, decoder_mask, w_scores2):
    """Pure-JAX transcription of the full PyTorch forward (for verification,
    including the decoder/mask pooling path that the kernel elides exactly)."""
    S, B, D = encoder_out.shape
    T = decoder_input.shape[0]
    enc_e = jnp.transpose(encoder_out, (1, 0, 2))[:, None, :, :]        # (B, 1, S, D)
    enc_e = jnp.broadcast_to(enc_e, (B, T, S, D))
    dec_e = jnp.transpose(decoder_input, (1, 0, 2))[:, :, None, :]      # (B, T, 1, D)
    dec_e = jnp.broadcast_to(dec_e, (B, T, T, D))
    dec_e = jnp.where(decoder_mask[None, :, :, None], 0.0, dec_e)
    dec_pool = jnp.mean(dec_e, axis=2)                                  # (B, T, D)
    x = enc_e + dec_pool[:, :, None, :]                                 # (B, T, S, D)
    scores = jnp.einsum("btsd,d->bts", x, w_scores2[0])                 # (B, T, S)
    soft = jax.nn.softmax(scores, axis=-1)
    return jnp.maximum(soft - 0.1, 0.0)


if __name__ == "__main__":
    key = jax.random.PRNGKey(0)
    src_len, tgt_len, batch, embed_dim = 16, 8, 2, 32

    k_enc, k_dec, k_w = jax.random.split(key, 3)
    encoder_out = jax.random.normal(k_enc, (src_len, batch, embed_dim), dtype=jnp.float32)
    decoder_input = jax.random.normal(k_dec, (tgt_len, batch, embed_dim), dtype=jnp.float32)
    # causal decoder mask: True = masked (future positions)
    decoder_mask = jnp.triu(jnp.ones((tgt_len, tgt_len), dtype=bool), k=1)

    # scores2: Linear(embed_dim, 1, bias=False), xavier_uniform init (deterministic)
    bound = (6.0 / (embed_dim + 1)) ** 0.5
    w_scores2 = jax.random.uniform(k_w, (1, embed_dim), jnp.float32, minval=-bound, maxval=bound)

    out = dynamic_select_mask(encoder_out, decoder_input, decoder_mask, w_scores2)
    out = jax.block_until_ready(out)

    ref = _reference(encoder_out, decoder_input, decoder_mask, w_scores2)
    assert out.shape == (batch, tgt_len, src_len)
    assert jnp.allclose(out, ref, atol=1e-5, rtol=1e-5), "mismatch vs reference"

    print("KERNEL_OK")
</pallas_src>

<mosaic_0001>
module attributes {stable_mosaic.version = 11 : i64} {
  func.func @_dsm_kernel(%arg0: i32, %arg1: i32, %arg2: memref<16x2x32xf32, #tpu.memory_space<vmem>>, %arg3: memref<1x1x32xf32, #tpu.memory_space<vmem>>, %arg4: memref<2x16xf32, #tpu.memory_space<vmem>>) attributes {dimension_semantics = [#tpu.dimension_semantics<parallel>, #tpu.dimension_semantics<arbitrary>], iteration_bounds = array<i64: 1, 1>, scalar_prefetch = 0 : i64, scratch_operands = 0 : i64, tpu.core_type = #tpu.core_type<tc>, window_params = [{transform_indices = @transform_0, window_bounds = array<i64: 16, 2, 32>}, {pipeline_mode = #tpu.pipeline_mode<synchronous>, transform_indices = @transform_1, window_bounds = array<i64: 1, 1, 32>}, {transform_indices = @transform_2, window_bounds = array<i64: 2, 16>}]} {
    %c0 = arith.constant 0 : index
    %c0_0 = arith.constant 0 : index
    %c0_1 = arith.constant 0 : index
    %0 = vector.load %arg2[%c0, %c0_0, %c0_1] : memref<16x2x32xf32, #tpu.memory_space<vmem>>, vector<16x2x32xf32>
    %c0_2 = arith.constant 0 : index
    %c0_3 = arith.constant 0 : index
    %c0_4 = arith.constant 0 : index
    %1 = vector.load %arg3[%c0_2, %c0_3, %c0_4] : memref<1x1x32xf32, #tpu.memory_space<vmem>>, vector<1x1x32xf32>
    %2 = vector.broadcast %1 : vector<1x1x32xf32> to vector<16x2x32xf32>
    %3 = arith.mulf %0, %2 : vector<16x2x32xf32>
    %cst = arith.constant dense<0.000000e+00> : vector<16x2xf32>
    %4 = vector.multi_reduction <add>, %3, %cst [2] : vector<16x2x32xf32> to vector<16x2xf32>
    %5 = tpu.transpose %4, [1, 0] : vector<16x2xf32> -> vector<2x16xf32>
    %c0_5 = arith.constant 0 : index
    %c0_6 = arith.constant 0 : index
    %6 = vector.load %arg4[%c0_5, %c0_6] : memref<2x16xf32, #tpu.memory_space<vmem>>, vector<2x16xf32>
    tpu.vector_store %arg4[%c0_5, %c0_6], %5 {strides = array<i32>} : memref<2x16xf32, #tpu.memory_space<vmem>>, vector<2x16xf32>,
    %c0_i32 = arith.constant 0 : i32
    %7 = arith.cmpi eq, %arg1, %c0_i32 : i32
    %8 = arith.extui %7 : i1 to i32
    %c0_i32_7 = arith.constant 0 : i32
    %9 = arith.cmpi ne, %8, %c0_i32_7 : i32
    scf.if %9 {
      %c0_8 = arith.constant 0 : index
      %c0_9 = arith.constant 0 : index
      %10 = vector.load %arg4[%c0_8, %c0_9] : memref<2x16xf32, #tpu.memory_space<vmem>>, vector<2x16xf32>
      %cst_10 = arith.constant dense<0xFF800000> : vector<2xf32>
      %11 = vector.multi_reduction <maximumf>, %10, %cst_10 [1] : vector<2x16xf32> to vector<2xf32>
      %12 = vector.shape_cast %11 : vector<2xf32> to vector<2x1xf32>
      %13 = vector.broadcast %12 : vector<2x1xf32> to vector<2x16xf32>
      %14 = arith.subf %10, %13 : vector<2x16xf32>
      %15 = math.exp %14 : vector<2x16xf32>
      %cst_11 = arith.constant dense<0.000000e+00> : vector<2xf32>
      %16 = vector.multi_reduction <add>, %15, %cst_11 [1] : vector<2x16xf32> to vector<2xf32>
      %17 = vector.shape_cast %16 : vector<2xf32> to vector<2x1xf32>
      %18 = vector.broadcast %17 : vector<2x1xf32> to vector<2x16xf32>
      %19 = arith.divf %15, %18 : vector<2x16xf32>
      %cst_12 = arith.constant 1.000000e-01 : f32
      %20 = vector.broadcast %cst_12 : f32 to vector<2x16xf32>
      %21 = arith.subf %19, %20 : vector<2x16xf32>
      %cst_13 = arith.constant 0.000000e+00 : f32
      %22 = vector.broadcast %cst_13 : f32 to vector<2x16xf32>
      %23 = arith.maximumf %21, %22 : vector<2x16xf32>
      %c0_14 = arith.constant 0 : index
      %c0_15 = arith.constant 0 : index
      %24 = vector.load %arg4[%c0_14, %c0_15] : memref<2x16xf32, #tpu.memory_space<vmem>>, vector<2x16xf32>
      tpu.vector_store %arg4[%c0_14, %c0_15], %23 {strides = array<i32>} : memref<2x16xf32, #tpu.memory_space<vmem>>, vector<2x16xf32>,
    } else {
    }
    return
  }
  func.func @transform_0(%arg0: i32, %arg1: i32) -> (i32, i32, i32) {
    %c0_i32 = arith.constant 0 : i32
    %c0_i32_0 = arith.constant 0 : i32
    return %arg1, %arg0, %c0_i32 : i32, i32, i32
  }
  func.func @transform_1(%arg0: i32, %arg1: i32) -> (i32, i32, i32) {
    %c0_i32 = arith.constant 0 : i32
    %c0_i32_0 = arith.constant 0 : i32
    %c0_i32_1 = arith.constant 0 : i32
    %c0_i32_2 = arith.constant 0 : i32
    return %c0_i32, %c0_i32_0, %c0_i32_1 : i32, i32, i32
  }
  func.func @transform_2(%arg0: i32, %arg1: i32) -> (i32, i32) {
    %c0_i32 = arith.constant 0 : i32
    %c0_i32_0 = arith.constant 0 : i32
    return %arg0, %c0_i32 : i32, i32
  }
}

</mosaic_0001>

<bundles_post_ra>
// kernel: tpu_custom_call.1
= control target key start
LH: loop header
LB: loop body
LE: loop exit
PB: predicated region body
PF: predicated region fallthrough
CT: control target
= control target key end

     0   :  { %7 = vsyncpa [#allocation3], 0  ;;  %s426_s0 = inlined_call_operand.hbm [shape: f32[16,2,32], index: 0, kind: input, shape index: {}]   ;;  %s427_s1 = inlined_call_operand.vmem [shape: f32[1,1,32], index: 1, kind: input, shape index: {}]   ;;  %s428_s2 = inlined_call_operand.hbm [shape: f32[2,16], index: 2, kind: output, shape index: {}]  }
   0x1   :  { %8 = vsyncpa [#allocation4], 0  ;;  %s346_s9 = smov [#allocation2]   ;;  %s298_s13 = scalar_lea.hbm %s426_s0, 512 }
   0x2   :  { %s14_s10 = sshll.u32 %s346_s9, 4  ;;  %p299_p0 = scmp.ne.s32.totalorder %s426_s0, %s298_s13  ;;  %s15_s10 = int_to_ptr.vmem [resolvable:$true] %s14_s10 }
   0x3   :  { %p302_p1 = scmp.lt.u32.totalorder %s298_s13, %s426_s0 }
   0x5   :  { %p304_p2 = pnand %p302_p1, %p299_p0 }
   0x7   :  { %307 = shalt.err (!%p304_p2)
}
   0x8   :  { %s308_s18 = scalar_lea.vmem %s15_s10, 512  ;;  %p313_p4 = scmp.lt.s32.totalorder %s15_s10, %s15_s10 }
   0x9   :  { %p309_p3 = scmp.ne.s32.totalorder %s15_s10, %s308_s18  ;;  %p314_p5 = scmp.lt.s32.totalorder %s308_s18, %s308_s18 }
   0xb   :  { %p315_p6 = por %p314_p5, %p313_p4 }
   0xd   :  { %p316_p7 = pnand %p315_p6, %p309_p3 }
   0xf   :  { %319 = shalt.err (!%p316_p7)
}
  0x10   :  { %s347_s19 = smov 32   ;;  %s348_s20 = smov 2  }
  0x11   :  { %20 = dma.hbm_to_vmem [thread:$0]  %s426_s0, 512, %s15_s10, [#allocation3], %s347_s19, %s347_s19, %s348_s20  }
  0x12   :  { %342 = dma.done.wait [#allocation3], 512  }
  0x13   :  { %343 = vsyncadd [#allocation3], 4294966784  ;;  %vm65_vm0 = vcmask 254976   ;;  %v28_v0 = vld [vmem:[#allocation2 + $0x4] sm:$0x3]  ;;  %v130_v51 = vlaneseq  ;;  %vm196_vm1 = vcmask 1041409  }
  0x14   :  { %v287_v1 = vld [vmem:[%s427_s1] ss:$0 sm:$0xff]  ;;  %v29_v5 = vld [vmem:[#allocation2 + $0x6] sm:$0x3]  ;;  %v27_v6 = vld [vmem:[#allocation2 + $0x2] sm:$0x3] }
  0x15   :  { %v26_v2 = vld [vmem:[#allocation2] sm:$0x3]  ;;  %v51_v3 = vmul.f32 %v287_v1, %v28_v0  ;;  %v52_v7 = vmul.f32 %v287_v1, %v29_v5  ;;  %v50_v8 = vmul.f32 %v287_v1, %v27_v6  ;;  %v35_v9 = vld [vmem:[#allocation2 + $0x12] sm:$0x3]  ;;  %v34_v10 = vld [vmem:[#allocation2 + $0x10] sm:$0x3] }
  0x16   :  { %v49_v4 = vmul.f32 %v287_v1, %v26_v2  ;;  %v58_v15 = vmul.f32 %v287_v1, %v35_v9  ;;  %v57_v16 = vmul.f32 %v287_v1, %v34_v10  ;;  %v36_v17 = vld [vmem:[#allocation2 + $0x14] sm:$0x3]  ;;  %v30_v18 = vld [vmem:[#allocation2 + $0x8] sm:$0x3]  ;;  %v37_v23 = vld [vmem:[#allocation2 + $0x16] sm:$0x3] }
  0x17   :  { %v72_v11 = vsel %vm65_vm0, %v51_v3, 0.0  ;;  %v75_v13 = vsel %vm65_vm0, %v52_v7, 0.0  ;;  %v69_v14 = vsel %vm65_vm0, %v50_v8, 0.0  ;;  %v59_v21 = vmul.f32 %v287_v1, %v36_v17  ;;  %v31_v24 = vld [vmem:[#allocation2 + $0xa] sm:$0x3]  ;;  %s349_s0 = smov [#allocation5]  }
  0x18   :  { %v66_v12 = vsel %vm65_vm0, %v49_v4, 0.0  ;;  %73 = vadd.xlane.f32.xlu1 %v72_v11  ;;  %v93_v19 = vsel %vm65_vm0, %v58_v15, 0.0  ;;  %v90_v20 = vsel %vm65_vm0, %v57_v16, 0.0  ;;  %v53_v22 = vmul.f32 %v287_v1, %v30_v18  ;;  %v38_v29 = vld [vmem:[#allocation2 + $0x18] sm:$0x3]  ;;  %s278_s1 = sshll.u32 %s349_s0, 4  ;;  %s279_s1 = int_to_ptr.vmem [resolvable:$true] %s278_s1 }
  0x19   :  { %67 = vadd.xlane.f32.xlu0 %v66_v12  ;;  %v96_v25 = vsel %vm65_vm0, %v59_v21, 0.0  ;;  %v60_v27 = vmul.f32 %v287_v1, %v37_v23  ;;  %v54_v28 = vmul.f32 %v287_v1, %v31_v24  ;;  %v32_v30 = vld [vmem:[#allocation2 + $0xc] sm:$0x3]  ;;  %v61_v33 = vmul.f32 %v287_v1, %v38_v29  ;;  %v39_v35 = vld [vmem:[#allocation2 + $0x1a] sm:$0x3]  ;;  %s320_s25 = scalar_lea.vmem %s279_s1, 32  ;;  %p325_p9 = scmp.lt.s32.totalorder %s279_s1, %s279_s1 }
  0x1a   :  { %v78_v26 = vsel %vm65_vm0, %v53_v22, 0.0  ;;  %v55_v34 = vmul.f32 %v287_v1, %v32_v30  ;;  %v33_v36 = vld [vmem:[#allocation2 + $0xe] sm:$0x3]  ;;  %v62_v39 = vmul.f32 %v287_v1, %v39_v35  ;;  %v40_v41 = vld [vmem:[#allocation2 + $0x1c] sm:$0x3]  ;;  %v131_v54 = vand.u32 127, %v130_v51  ;;  %p321_p8 = scmp.ne.s32.totalorder %s279_s1, %s320_s25  ;;  %p326_p10 = scmp.lt.s32.totalorder %s320_s25, %s320_s25 }
  0x1b   :  { %v99_v31 = vsel %vm65_vm0, %v60_v27, 0.0  ;;  %v81_v32 = vsel %vm65_vm0, %v54_v28, 0.0  ;;  %v102_v37 = vsel %vm65_vm0, %v61_v33, 0.0  ;;  %v56_v40 = vmul.f32 %v287_v1, %v33_v36  ;;  %v41_v42 = vld [vmem:[#allocation2 + $0x1e] sm:$0x3] }
  0x1c   :  { %76 = vadd.xlane.f32.xlu1 %v75_v13  ;;  %v84_v38 = vsel %vm65_vm0, %v55_v34, 0.0  ;;  %v105_v43 = vsel %vm65_vm0, %v62_v39, 0.0  ;;  %v63_v45 = vmul.f32 %v287_v1, %v40_v41  ;;  %v64_v46 = vmul.f32 %v287_v1, %v41_v42  ;;  %p327_p11 = por %p326_p10, %p325_p9 }
  0x1d   :  { %70 = vadd.xlane.f32.xlu0 %v69_v14  ;;  %v87_v44 = vsel %vm65_vm0, %v56_v40, 0.0  ;;  %v133_v55 = vshrl.u32 %v130_v51, 7  ;;  %vm198_vm2 = vcmask 1042434   ;;  %vm200_vm3 = vcmask 1043459  }
  0x1e   :  { %v108_v47 = vsel %vm65_vm0, %v63_v45, 0.0  ;;  %v111_v48 = vsel %vm65_vm0, %v64_v46, 0.0  ;;  %vm202_vm4 = vcmask 1044484   ;;  %vm204_vm5 = vcmask 1045509   ;;  %p328_p12 = pnand %p327_p11, %p321_p8 }
  0x1f   :  { %v134_v58 = vsub.s32 %v131_v54, %v133_v55  ;;  %vm206_vm6 = vcmask 1046534   ;;  %vm208_vm7 = vcmask 1047559   ;;  %vm251_vm8 = vcmask 123904  }
  0x20   :  { %94 = vadd.xlane.f32.xlu1 %v93_v19 }
  0x21   :  { %91 = vadd.xlane.f32.xlu0 %v90_v20 }
  0x24   :  { %97 = vadd.xlane.f32.xlu1 %v96_v25 }
  0x25   :  { %79 = vadd.xlane.f32.xlu0 %v78_v26 }
  0x28   :  { %100 = vadd.xlane.f32.xlu1 %v99_v31 }
  0x29   :  { %82 = vadd.xlane.f32.xlu0 %v81_v32 }
  0x2c   :  { %103 = vadd.xlane.f32.xlu1 %v102_v37 }
  0x2d   :  { %85 = vadd.xlane.f32.xlu0 %v84_v38 }
  0x30   :  { %106 = vadd.xlane.f32.xlu1 %v105_v43 }
  0x31   :  { %88 = vadd.xlane.f32.xlu0 %v87_v44 }
  0x34   :  { %112 = vadd.xlane.f32.xlu1 %v111_v48 }
  0x35   :  { %109 = vadd.xlane.f32.xlu0 %v108_v47 }
  0xa5   :  { %v74_v49 = vpop.xlane.xlu1 %73 }
  0xa6   :  { %v68_v50 = vpop.xlane.xlu0 %67  ;;  %v143_v2 = vrot.slane %v74_v49, %v134_v58 }
  0xa7   :  { %v135_v62 = vrot.slane %v68_v50, %v134_v58 }
  0xa9   :  { %v77_v52 = vpop.xlane.xlu1 %76 }
  0xaa   :  { %v71_v53 = vpop.xlane.xlu0 %70  ;;  %v147_v3 = vrot.slane %v77_v52, %v134_v58 }
  0xab   :  { %v139_v61 = vrot.slane %v71_v53, %v134_v58 }
  0xad   :  { %v95_v56 = vpop.xlane.xlu1 %94  ;;  %v197_v1 = vsel %vm196_vm1, %v139_v61, %v135_v62 }
  0xae   :  { %v92_v57 = vpop.xlane.xlu0 %91  ;;  %v199_v4 = vsel %vm198_vm2, %v143_v2, %v197_v1  ;;  %v171_v9 = vrot.slane %v95_v56, %v134_v58 }
  0xaf   :  { %v167_v10 = vrot.slane %v92_v57, %v134_v58  ;;  %v201_v13 = vsel %vm200_vm3, %v147_v3, %v199_v4 }
  0xb1   :  { %v98_v59 = vpop.xlane.xlu1 %97  ;;  %v210_v21 = vsel %vm196_vm1, %v171_v9, %v167_v10 }
  0xb2   :  { %v80_v60 = vpop.xlane.xlu0 %79  ;;  %v175_v12 = vrot.slane %v98_v59, %v134_v58 }
  0xb3   :  { %v151_v5 = vrot.slane %v80_v60, %v134_v58 }
  0xb4   :  { %v211_v24 = vsel %vm198_vm2, %v175_v12, %v210_v21 }
  0xb5   :  { %v101_v63 = vpop.xlane.xlu1 %100  ;;  %v203_v14 = vsel %vm202_vm4, %v151_v5, %v201_v13 }
  0xb6   :  { %v83_v0 = vpop.xlane.xlu0 %82  ;;  %v179_v15 = vrot.slane %v101_v63, %v134_v58 }
  0xb7   :  { %v155_v8 = vrot.slane %v83_v0, %v134_v58 }
  0xb8   :  { %v212_v26 = vsel %vm200_vm3, %v179_v15, %v211_v24 }
  0xb9   :  { %v104_v6 = vpop.xlane.xlu1 %103  ;;  %v205_v20 = vsel %vm204_vm5, %v155_v8, %v203_v14 }
  0xba   :  { %v86_v7 = vpop.xlane.xlu0 %85  ;;  %v183_v18 = vrot.slane %v104_v6, %v134_v58 }
  0xbb   :  { %v159_v11 = vrot.slane %v86_v7, %v134_v58 }
  0xbc   :  { %v213_v29 = vsel %vm202_vm4, %v183_v18, %v212_v26 }
  0xbd   :  { %v107_v16 = vpop.xlane.xlu1 %106  ;;  %v207_v23 = vsel %vm206_vm6, %v159_v11, %v205_v20 }
  0xbe   :  { %v89_v17 = vpop.xlane.xlu0 %88  ;;  %v187_v22 = vrot.slane %v107_v16, %v134_v58 }
  0xbf   :  { %v163_v19 = vrot.slane %v89_v17, %v134_v58 }
  0xc0   :  { %v214_v32 = vsel %vm204_vm5, %v187_v22, %v213_v29 }
  0xc1   :  { %v209_v25 = vsel %vm208_vm7, %v163_v19, %v207_v23  ;;  %v113_v28 = vpop.xlane.xlu1 %112 }
  0xc2   :  { %219 = vxpose.xlu0.b32.start [1/2] (short) (narrow) %v209_v25, 8  ;;  %v110_v27 = vpop.xlane.xlu0 %109  ;;  %v195_v31 = vrot.slane %v113_v28, %v134_v58 }
  0xc3   :  { %v191_v30 = vrot.slane %v110_v27, %v134_v58 }
  0xc5   :  { %v215_v33 = vsel %vm206_vm6, %v191_v30, %v214_v32 }
  0xc6   :  { %v216_v34 = vsel %vm208_vm7, %v195_v31, %v215_v33 }
  0xc7   :  { %220 = vxpose.xlu0.b32.end [2/2] (short) (narrow) %v216_v34, 8 }
 0x143   :  { %v235_v35 = vpop.trf.xlu0 }
 0x144   :  { %252 = vst.msk [vmem:[#allocation5] sm:$0x3] %vm251_vm8, %v235_v35 }
 0x14b   :  { %v257_v36 = vld [vmem:[#allocation5] sm:$0x3] }
 0x14c   :  { %v258_v37 = vsel %vm251_vm8, %v257_v36, -inf }
 0x14d   :  { %259 = vmax.xlane.f32.xlu1 %v258_v37 }
 0x1da   :  { %v260_v38 = vpop.xlane.xlu1 %259 }
 0x1db   :  { %v261_v39 = vsub.f32 %v257_v36, %v260_v38 }
 0x1dd   :  { %v262_v40 = vmul.f32 1.442695, %v261_v39 }
 0x1df   :  { %294 = vpow2.f32 %v262_v40 }
 0x1e9   :  { %v295_v41 = vpop.eup %294 }
 0x1ea   :  { %v264_v42 = vsel %vm251_vm8, %v295_v41, 0.0 }
 0x1eb   :  { %265 = vadd.xlane.f32.xlu1 %v264_v42 }
 0x278   :  { %v266_v43 = vpop.xlane.xlu1 %265 }
 0x279   :  { %296 = vrcp.f32 %v266_v43 }
 0x283   :  { %v297_v44 = vpop.eup %296 }
 0x284   :  { %v268_v45 = vmul.f32 %v297_v44, %v295_v41 }
 0x286   :  { %v288_v46 = vadd.f32 -0.1, %v268_v45 }
 0x288   :  { %v270_v47 = vmax.f32 %v288_v46, 0.0 }
 0x28a   :  { %271 = vst.msk [vmem:[#allocation5] sm:$0x3] %vm251_vm8, %v270_v47 }
 0x28b   :  { %331 = shalt.err (!%p328_p12)
}
 0x28c   :  { %s332_s28 = scalar_lea.hbm %s428_s2, 32 }
 0x28d   :  { %p333_p13 = scmp.ne.s32.totalorder %s428_s2, %s332_s28  ;;  %p336_p0 = scmp.lt.u32.totalorder %s332_s28, %s428_s2 }
 0x28f   :  { %p338_p1 = pnand %p336_p0, %p333_p13 }
 0x291   :  { %341 = shalt.err (!%p338_p1)
}
 0x292   :  { %281 = dma.vmem_to_hbm [thread:$0]  %s279_s1, 32, %s428_s2, [#allocation4]  }
 0x293   :  { %344 = dma.done.wait [#allocation4], 32  }
 0x294   :  { %345 = vsyncadd [#allocation4], 4294967264 }
 0x295   :  { %285 = vsyncpa [#allocation3], 1 }
 0x296   :  { %286 = vsyncpa [#allocation4], 1 }

</bundles_post_ra>
